<compile_context>
chip_gen: v7x
topology: tpu7x:2x2x1
jax: 0.10.0
libtpu: 0.0.40
codegen_flags: <defaults>
</compile_context>

<pallas_src>
import functools
import math

import jax
import jax.numpy as jnp
from jax.experimental import pallas as pl
from jax.experimental.pallas import tpu as pltpu

LANE = 128       # vreg lane width
SUBLANE = 8      # f32 sublane count


def _round_up(x, m):
    return ((x + m - 1) // m) * m


def mlp_kernel(x_ref,
               w1_ref, b1_ref, w2_ref, b2_ref, w3_ref, b3_ref,
               w4_ref, b4_ref, w5_ref, b5_ref,
               out_ref):
    """One batch tile of the 5-layer MLP, everything resident in VMEM.

    Matmul operands are cast to the weights' dtype (bf16 by default) so the MXU
    runs at its bf16 rate; accumulation and all elementwise work (bias add, ReLU)
    stay in f32 (important on v5e, which has no bf16 VALU/EUP).
    """

    def dense(h, w_ref, b_ref):
        acc = jnp.dot(h.astype(w_ref.dtype), w_ref[...],
                      preferred_element_type=jnp.float32)
        return acc + b_ref[...].astype(jnp.float32)

    h = x_ref[...]
    h = jnp.maximum(dense(h, w1_ref, b1_ref), 0.0)   # layer1: Linear + ReLU
    h = jnp.maximum(dense(h, w2_ref, b2_ref), 0.0)   # layer2: Linear + ReLU
    h = jnp.maximum(dense(h, w3_ref, b3_ref), 0.0)   # layer3: Linear + ReLU
    h = jnp.maximum(dense(h, w4_ref, b4_ref), 0.0)   # layer4: Linear + ReLU
    out = dense(h, w5_ref, b5_ref)                   # layer5: Linear (no activation)
    out_ref[...] = out.astype(out_ref.dtype)


@functools.partial(jax.jit, static_argnames=("bm", "compute_dtype"))
def ann_4hidden_forward(x, params, *, bm=256, compute_dtype=jnp.bfloat16):
    """params = ((w1, b1), ..., (w5, b5)); wi: [fan_in, fan_out], bi: [1, fan_out]."""
    B, in_dim = x.shape
    out_dim = params[-1][0].shape[1]

    # --- batch tiling: pad B up so the grid divides evenly ------------------
    bm = _round_up(bm, SUBLANE)
    bm_eff = min(bm, _round_up(B, SUBLANE))   # tiny demo -> single grid step
    b_pad = _round_up(B, bm_eff)
    if b_pad != B:
        x = jnp.pad(x, ((0, b_pad - B), (0, 0)))

    # --- prepare weights: cast to compute dtype, lane-pad the final layer ---
    out_pad = _round_up(out_dim, LANE)
    flat = []
    for li, (w, b) in enumerate(params):
        w = w.astype(compute_dtype)
        b = b.astype(jnp.float32)
        if li == len(params) - 1 and out_pad != out_dim:
            w = jnp.pad(w, ((0, 0), (0, out_pad - out_dim)))
            b = jnp.pad(b, ((0, 0), (0, out_pad - out_dim)))
        flat.extend([w, b])

    def full_spec(arr):
        # Whole weight / bias resident in VMEM. The block index never changes
        # across grid steps, so Pallas does not re-copy it per step.
        # (Single-buffering via pipeline_mode=pl.Buffered(1) would save a few KB
        #  of VMEM; omitted here — footprint is tiny at this model size.)
        return pl.BlockSpec(arr.shape, lambda i, n=arr.ndim: (0,) * n)

    in_specs = [pl.BlockSpec((bm_eff, in_dim), lambda i: (i, 0))]
    in_specs += [full_spec(a) for a in flat]
    out_specs = pl.BlockSpec((bm_eff, out_pad), lambda i: (i, 0))

    out = pl.pallas_call(
        mlp_kernel,
        out_shape=jax.ShapeDtypeStruct((b_pad, out_pad), x.dtype),
        grid_spec=pl.GridSpec(
            grid=(b_pad // bm_eff,),
            in_specs=in_specs,
            out_specs=out_specs,
        ),
        compiler_params=pltpu.CompilerParams(
            # Batch axis is embarrassingly parallel -> v7x megacore sharding
            # when b_pad // bm_eff >= 2. VMEM footprint is <1 MiB at bm=256,
            # so no explicit vmem_limit_bytes is required even on v7x (64 MiB).
            dimension_semantics=("parallel",)),
    )(x, *flat)

    return out[:B, :out_dim]


def init_params(key, dims):
    """Deterministic PyTorch-style init: U(-1/sqrt(fan_in), 1/sqrt(fan_in))."""
    params = []
    for fan_in, fan_out in zip(dims[:-1], dims[1:]):
        key, kw, kb = jax.random.split(key, 3)
        bound = 1.0 / math.sqrt(fan_in)
        w = jax.random.uniform(kw, (fan_in, fan_out), jnp.float32, -bound, bound)
        b = jax.random.uniform(kb, (1, fan_out), jnp.float32, -bound, bound)
        params.append((w, b))
    return tuple(params)


def reference_forward(x, params, compute_dtype=None):
    """Pure-JAX reference. With compute_dtype set, mirrors the kernel's mixed
    precision (bf16 matmul operands, f32 accumulate + elementwise)."""
    h = x
    n = len(params)
    for i, (w, b) in enumerate(params):
        if compute_dtype is not None:
            h = jnp.dot(h.astype(compute_dtype), w.astype(compute_dtype),
                        preferred_element_type=jnp.float32) + b
        else:
            h = h @ w + b
        if i < n - 1:
            h = jnp.maximum(h, 0.0)
    return h


if __name__ == "__main__":
    # in_dim=32, hidden = (64, 64, 32, 32), out_dim=8, batch=16
    dims = (32, 64, 64, 32, 32, 8)
    B = 16

    key = jax.random.PRNGKey(0)
    kx, kp = jax.random.split(key)
    x = jax.random.normal(kx, (B, dims[0]), jnp.float32)
    params = init_params(kp, dims)

    out = ann_4hidden_forward(x, params)
    out = jax.block_until_ready(out)
    assert out.shape == (B, dims[-1])

    # Tight check vs a reference that mirrors the kernel's mixed-precision math.
    ref_mixed = reference_forward(x, params, compute_dtype=jnp.bfloat16)
    assert jnp.allclose(out, ref_mixed, atol=2e-3, rtol=2e-3), \
        "mismatch vs mixed-precision reference"

    # Loose sanity check vs the pure-f32 PyTorch-semantics forward.
    ref_f32 = reference_forward(x, params)
    assert jnp.allclose(out, ref_f32, atol=5e-2, rtol=5e-2), \
        "mismatch vs f32 reference"

    print("KERNEL_OK")
</pallas_src>

<mosaic_0001>
module attributes {stable_mosaic.version = 11 : i64} {
  func.func @mlp_kernel(%arg0: i32, %arg1: memref<16x32xf32, #tpu.memory_space<vmem>>, %arg2: memref<32x64xbf16, #tpu.memory_space<vmem>>, %arg3: memref<1x64xf32, #tpu.memory_space<vmem>>, %arg4: memref<64x64xbf16, #tpu.memory_space<vmem>>, %arg5: memref<1x64xf32, #tpu.memory_space<vmem>>, %arg6: memref<64x32xbf16, #tpu.memory_space<vmem>>, %arg7: memref<1x32xf32, #tpu.memory_space<vmem>>, %arg8: memref<32x32xbf16, #tpu.memory_space<vmem>>, %arg9: memref<1x32xf32, #tpu.memory_space<vmem>>, %arg10: memref<32x128xbf16, #tpu.memory_space<vmem>>, %arg11: memref<1x128xf32, #tpu.memory_space<vmem>>, %arg12: memref<16x128xf32, #tpu.memory_space<vmem>>) attributes {dimension_semantics = [#tpu.dimension_semantics<parallel>], iteration_bounds = array<i64: 1>, scalar_prefetch = 0 : i64, scratch_operands = 0 : i64, tpu.core_type = #tpu.core_type<tc>, window_params = [{transform_indices = @transform_0, window_bounds = array<i64: 16, 32>}, {pipeline_mode = #tpu.pipeline_mode<synchronous>, transform_indices = @transform_1, window_bounds = array<i64: 32, 64>}, {pipeline_mode = #tpu.pipeline_mode<synchronous>, transform_indices = @transform_2, window_bounds = array<i64: 1, 64>}, {pipeline_mode = #tpu.pipeline_mode<synchronous>, transform_indices = @transform_3, window_bounds = array<i64: 64, 64>}, {pipeline_mode = #tpu.pipeline_mode<synchronous>, transform_indices = @transform_4, window_bounds = array<i64: 1, 64>}, {pipeline_mode = #tpu.pipeline_mode<synchronous>, transform_indices = @transform_5, window_bounds = array<i64: 64, 32>}, {pipeline_mode = #tpu.pipeline_mode<synchronous>, transform_indices = @transform_6, window_bounds = array<i64: 1, 32>}, {pipeline_mode = #tpu.pipeline_mode<synchronous>, transform_indices = @transform_7, window_bounds = array<i64: 32, 32>}, {pipeline_mode = #tpu.pipeline_mode<synchronous>, transform_indices = @transform_8, window_bounds = array<i64: 1, 32>}, {pipeline_mode = #tpu.pipeline_mode<synchronous>, transform_indices = @transform_9, window_bounds = array<i64: 32, 128>}, {pipeline_mode = #tpu.pipeline_mode<synchronous>, transform_indices = @transform_10, window_bounds = array<i64: 1, 128>}, {transform_indices = @transform_11, window_bounds = array<i64: 16, 128>}]} {
    %c0 = arith.constant 0 : index
    %c0_0 = arith.constant 0 : index
    %0 = vector.load %arg1[%c0, %c0_0] : memref<16x32xf32, #tpu.memory_space<vmem>>, vector<16x32xf32>
    %1 = arith.truncf %0 : vector<16x32xf32> to vector<16x32xbf16>
    %c0_1 = arith.constant 0 : index
    %c0_2 = arith.constant 0 : index
    %2 = vector.load %arg2[%c0_1, %c0_2] : memref<32x64xbf16, #tpu.memory_space<vmem>>, vector<32x64xbf16>
    %cst = arith.constant dense<0.000000e+00> : vector<16x64xf32>
    %3 = tpu.matmul %1, %2, %cst {dimension_numbers = #tpu.dot_dimension_numbers<[1], [0], [0], [1], [0, 0, 1, 1], [], []>} : vector<16x32xbf16>, vector<32x64xbf16>, vector<16x64xf32> -> vector<16x64xf32>
    %c0_3 = arith.constant 0 : index
    %c0_4 = arith.constant 0 : index
    %4 = vector.load %arg3[%c0_3, %c0_4] : memref<1x64xf32, #tpu.memory_space<vmem>>, vector<1x64xf32>
    %5 = vector.broadcast %4 : vector<1x64xf32> to vector<16x64xf32>
    %6 = arith.addf %3, %5 : vector<16x64xf32>
    %cst_5 = arith.constant 0.000000e+00 : f32
    %7 = vector.broadcast %cst_5 : f32 to vector<16x64xf32>
    %8 = arith.maximumf %6, %7 : vector<16x64xf32>
    %9 = arith.truncf %8 : vector<16x64xf32> to vector<16x64xbf16>
    %c0_6 = arith.constant 0 : index
    %c0_7 = arith.constant 0 : index
    %10 = vector.load %arg4[%c0_6, %c0_7] : memref<64x64xbf16, #tpu.memory_space<vmem>>, vector<64x64xbf16>
    %cst_8 = arith.constant dense<0.000000e+00> : vector<16x64xf32>
    %11 = tpu.matmul %9, %10, %cst_8 {dimension_numbers = #tpu.dot_dimension_numbers<[1], [0], [0], [1], [0, 0, 1, 1], [], []>} : vector<16x64xbf16>, vector<64x64xbf16>, vector<16x64xf32> -> vector<16x64xf32>
    %c0_9 = arith.constant 0 : index
    %c0_10 = arith.constant 0 : index
    %12 = vector.load %arg5[%c0_9, %c0_10] : memref<1x64xf32, #tpu.memory_space<vmem>>, vector<1x64xf32>
    %13 = vector.broadcast %12 : vector<1x64xf32> to vector<16x64xf32>
    %14 = arith.addf %11, %13 : vector<16x64xf32>
    %cst_11 = arith.constant 0.000000e+00 : f32
    %15 = vector.broadcast %cst_11 : f32 to vector<16x64xf32>
    %16 = arith.maximumf %14, %15 : vector<16x64xf32>
    %17 = arith.truncf %16 : vector<16x64xf32> to vector<16x64xbf16>
    %c0_12 = arith.constant 0 : index
    %c0_13 = arith.constant 0 : index
    %18 = vector.load %arg6[%c0_12, %c0_13] : memref<64x32xbf16, #tpu.memory_space<vmem>>, vector<64x32xbf16>
    %cst_14 = arith.constant dense<0.000000e+00> : vector<16x32xf32>
    %19 = tpu.matmul %17, %18, %cst_14 {dimension_numbers = #tpu.dot_dimension_numbers<[1], [0], [0], [1], [0, 0, 1, 1], [], []>} : vector<16x64xbf16>, vector<64x32xbf16>, vector<16x32xf32> -> vector<16x32xf32>
    %c0_15 = arith.constant 0 : index
    %c0_16 = arith.constant 0 : index
    %20 = vector.load %arg7[%c0_15, %c0_16] : memref<1x32xf32, #tpu.memory_space<vmem>>, vector<1x32xf32>
    %21 = vector.broadcast %20 : vector<1x32xf32> to vector<16x32xf32>
    %22 = arith.addf %19, %21 : vector<16x32xf32>
    %cst_17 = arith.constant 0.000000e+00 : f32
    %23 = vector.broadcast %cst_17 : f32 to vector<16x32xf32>
    %24 = arith.maximumf %22, %23 : vector<16x32xf32>
    %25 = arith.truncf %24 : vector<16x32xf32> to vector<16x32xbf16>
    %c0_18 = arith.constant 0 : index
    %c0_19 = arith.constant 0 : index
    %26 = vector.load %arg8[%c0_18, %c0_19] : memref<32x32xbf16, #tpu.memory_space<vmem>>, vector<32x32xbf16>
    %cst_20 = arith.constant dense<0.000000e+00> : vector<16x32xf32>
    %27 = tpu.matmul %25, %26, %cst_20 {dimension_numbers = #tpu.dot_dimension_numbers<[1], [0], [0], [1], [0, 0, 1, 1], [], []>} : vector<16x32xbf16>, vector<32x32xbf16>, vector<16x32xf32> -> vector<16x32xf32>
    %c0_21 = arith.constant 0 : index
    %c0_22 = arith.constant 0 : index
    %28 = vector.load %arg9[%c0_21, %c0_22] : memref<1x32xf32, #tpu.memory_space<vmem>>, vector<1x32xf32>
    %29 = vector.broadcast %28 : vector<1x32xf32> to vector<16x32xf32>
    %30 = arith.addf %27, %29 : vector<16x32xf32>
    %cst_23 = arith.constant 0.000000e+00 : f32
    %31 = vector.broadcast %cst_23 : f32 to vector<16x32xf32>
    %32 = arith.maximumf %30, %31 : vector<16x32xf32>
    %33 = arith.truncf %32 : vector<16x32xf32> to vector<16x32xbf16>
    %c0_24 = arith.constant 0 : index
    %c0_25 = arith.constant 0 : index
    %34 = vector.load %arg10[%c0_24, %c0_25] : memref<32x128xbf16, #tpu.memory_space<vmem>>, vector<32x128xbf16>
    %cst_26 = arith.constant dense<0.000000e+00> : vector<16x128xf32>
    %35 = tpu.matmul %33, %34, %cst_26 {dimension_numbers = #tpu.dot_dimension_numbers<[1], [0], [0], [1], [0, 0, 1, 1], [], []>} : vector<16x32xbf16>, vector<32x128xbf16>, vector<16x128xf32> -> vector<16x128xf32>
    %c0_27 = arith.constant 0 : index
    %c0_28 = arith.constant 0 : index
    %36 = vector.load %arg11[%c0_27, %c0_28] : memref<1x128xf32, #tpu.memory_space<vmem>>, vector<1x128xf32>
    %37 = vector.broadcast %36 : vector<1x128xf32> to vector<16x128xf32>
    %38 = arith.addf %35, %37 : vector<16x128xf32>
    %c0_29 = arith.constant 0 : index
    %c0_30 = arith.constant 0 : index
    %39 = vector.load %arg12[%c0_29, %c0_30] : memref<16x128xf32, #tpu.memory_space<vmem>>, vector<16x128xf32>
    tpu.vector_store %arg12[%c0_29, %c0_30], %38 {strides = array<i32>} : memref<16x128xf32, #tpu.memory_space<vmem>>, vector<16x128xf32>,
    return
  }
  func.func @transform_0(%arg0: i32) -> (i32, i32) {
    %c0_i32 = arith.constant 0 : i32
    %c0_i32_0 = arith.constant 0 : i32
    return %arg0, %c0_i32 : i32, i32
  }
  func.func @transform_1(%arg0: i32) -> (i32, i32) {
    %c0_i32 = arith.constant 0 : i32
    %c0_i32_0 = arith.constant 0 : i32
    %c0_i32_1 = arith.constant 0 : i32
    return %c0_i32, %c0_i32_0 : i32, i32
  }
  func.func @transform_2(%arg0: i32) -> (i32, i32) {
    %c0_i32 = arith.constant 0 : i32
    %c0_i32_0 = arith.constant 0 : i32
    %c0_i32_1 = arith.constant 0 : i32
    return %c0_i32, %c0_i32_0 : i32, i32
  }
  func.func @transform_3(%arg0: i32) -> (i32, i32) {
    %c0_i32 = arith.constant 0 : i32
    %c0_i32_0 = arith.constant 0 : i32
    %c0_i32_1 = arith.constant 0 : i32
    return %c0_i32, %c0_i32_0 : i32, i32
  }
  func.func @transform_4(%arg0: i32) -> (i32, i32) {
    %c0_i32 = arith.constant 0 : i32
    %c0_i32_0 = arith.constant 0 : i32
    %c0_i32_1 = arith.constant 0 : i32
    return %c0_i32, %c0_i32_0 : i32, i32
  }
  func.func @transform_5(%arg0: i32) -> (i32, i32) {
    %c0_i32 = arith.constant 0 : i32
    %c0_i32_0 = arith.constant 0 : i32
    %c0_i32_1 = arith.constant 0 : i32
    return %c0_i32, %c0_i32_0 : i32, i32
  }
  func.func @transform_6(%arg0: i32) -> (i32, i32) {
    %c0_i32 = arith.constant 0 : i32
    %c0_i32_0 = arith.constant 0 : i32
    %c0_i32_1 = arith.constant 0 : i32
    return %c0_i32, %c0_i32_0 : i32, i32
  }
  func.func @transform_7(%arg0: i32) -> (i32, i32) {
    %c0_i32 = arith.constant 0 : i32
    %c0_i32_0 = arith.constant 0 : i32
    %c0_i32_1 = arith.constant 0 : i32
    return %c0_i32, %c0_i32_0 : i32, i32
  }
  func.func @transform_8(%arg0: i32) -> (i32, i32) {
    %c0_i32 = arith.constant 0 : i32
    %c0_i32_0 = arith.constant 0 : i32
    %c0_i32_1 = arith.constant 0 : i32
    return %c0_i32, %c0_i32_0 : i32, i32
  }
  func.func @transform_9(%arg0: i32) -> (i32, i32) {
    %c0_i32 = arith.constant 0 : i32
    %c0_i32_0 = arith.constant 0 : i32
    %c0_i32_1 = arith.constant 0 : i32
    return %c0_i32, %c0_i32_0 : i32, i32
  }
  func.func @transform_10(%arg0: i32) -> (i32, i32) {
    %c0_i32 = arith.constant 0 : i32
    %c0_i32_0 = arith.constant 0 : i32
    %c0_i32_1 = arith.constant 0 : i32
    return %c0_i32, %c0_i32_0 : i32, i32
  }
  func.func @transform_11(%arg0: i32) -> (i32, i32) {
    %c0_i32 = arith.constant 0 : i32
    %c0_i32_0 = arith.constant 0 : i32
    return %arg0, %c0_i32 : i32, i32
  }
}

</mosaic_0001>

<bundles_post_ra>
// kernel: ann_4hidden_forward.1
= control target key start
LH: loop header
LB: loop body
LE: loop exit
PB: predicated region body
PF: predicated region fallthrough
CT: control target
= control target key end

     0   :  { %v536_v0 = vmov 0.0   ;;  %vm537_vm0 = vmmov 0   ;;  %vm65_vm1 = vcmask 261120   ;;  %vm152_vm2 = vcmask 523264   ;;  %s696_s1 = inlined_call_operand.vmem [shape: bf16[32,64], index: 1, kind: input, shape index: {}]   ;;  %s697_s0 = inlined_call_operand.vmem [shape: f32[16,32], index: 0, kind: input, shape index: {}]   ;;  %s698_s3 = inlined_call_operand.vmem [shape: bf16[64,64], index: 3, kind: input, shape index: {}]   ;;  %s699_s5 = inlined_call_operand.vmem [shape: bf16[64,32], index: 5, kind: input, shape index: {}]   ;;  %s700_s2 = inlined_call_operand.vmem [shape: f32[1,64], index: 2, kind: input, shape index: {}]   ;;  %s701_s4 = inlined_call_operand.vmem [shape: f32[1,64], index: 4, kind: input, shape index: {}]   ;;  %s702_s7 = inlined_call_operand.vmem [shape: bf16[32,32], index: 7, kind: input, shape index: {}]   ;;  %s703_s6 = inlined_call_operand.vmem [shape: f32[1,32], index: 6, kind: input, shape index: {}]   ;;  %s704_s9 = inlined_call_operand.vmem [shape: bf16[32,128], index: 9, kind: input, shape index: {}]   ;;  %s705_s8 = inlined_call_operand.vmem [shape: f32[1,32], index: 8, kind: input, shape index: {}]   ;;  %s706_s10 = inlined_call_operand.vmem [shape: f32[1,128], index: 10, kind: input, shape index: {}]   ;;  %s707_s11 = inlined_call_operand.vmem [shape: f32[16,128], index: 11, kind: output, shape index: {}]  }
   0x1   :  { %472 = vmatprep.subr.bf16.mxu0 %v536_v0  ;;  %v522_v1 = vld [vmem:[%s696_s1] sm:$0xff]   ;;  %476 = vmatprep.mubr.msk.bf16.mxu0 %vm537_vm0, %v536_v0  ;;  %v523_v2 = vld [vmem:[%s696_s1 + $0x8] sm:$0xff]   ;;  %v526_v8 = vld [vmem:[%s698_s3 + $0x10] sm:$0xff]  }
   0x2   :  { %480 = vmatprep.subr.bf16.mxu1 %v536_v0  ;;  %488 = vmatprep.mubr.msk.bf16.mxu1 %vm537_vm0, %v536_v0  ;;  %v39_v3 = vld [vmem:[%s697_s0] sm:$0xff]  ;;  %v40_v4 = vld [vmem:[%s697_s0 + $0x8] sm:$0xff]  ;;  %v527_v9 = vld [vmem:[%s698_s3 + $0x18] sm:$0xff]  }
   0x3   :  { %473 = vmatpush3.bf16.msra.mxu0 %v522_v1  ;;  %v524_v5 = vld [vmem:[%s698_s3] sm:$0xff]   ;;  %v525_v6 = vld [vmem:[%s698_s3 + $0x8] sm:$0xff]   ;;  %v41_v7 = vpack.c.bf16 %v40_v4, %v39_v3  ;;  %v530_v22 = vld [vmem:[%s699_s5 + $0x10] sm:$0xff]  }
   0x4   :  { %474 = vmatprep.subr.bf16.mxu0 %v536_v0  ;;  %481 = vmatpush3.bf16.msra.mxu1 %v524_v5  ;;  %v528_v10 = vld [vmem:[%s699_s5] sm:$0xff]   ;;  %v529_v11 = vld [vmem:[%s699_s5 + $0x8] sm:$0xff]   ;;  %v531_v23 = vld [vmem:[%s699_s5 + $0x18] sm:$0xff]  }
   0x5   :  { %482 = vmatprep.subr.bf16.mxu1 %v536_v0  ;;  %v429_v12 = vld [vmem:[%s700_s2] ss:$0 sm:$0xff]  ;;  %v533_v35 = vld [vmem:[%s702_s7 + $0x8] sm:$0xff]  }
   0x6   :  { %v433_v24 = vld [vmem:[%s701_s4] ss:$0 sm:$0xff]  ;;  %v535_v47 = vld [vmem:[%s704_s9 + $0x8] sm:$0xff]  }
   0x7   :  { %475 = vmatpush3.bf16.msra.mxu0 %v523_v2  ;;  %v532_v34 = vld [vmem:[%s702_s7] sm:$0xff]  }
   0x8   :  { %492 = vmatprep.subr.bf16.mxu0 %v536_v0  ;;  %483 = vmatpush3.bf16.msra.mxu1 %v525_v6  ;;  %v439_v36 = vld [vmem:[%s703_s6] ss:$0 sm:$0xff] }
   0x9   :  { %484 = vmatprep.subr.bf16.mxu1 %v536_v0  ;;  %v534_v46 = vld [vmem:[%s704_s9] sm:$0xff]  }
   0xa   :  { %477 = vmatmul.mubr.msk.bf16.vlgmr.msra.gmra.mrb[0].mxu0 %vm65_vm1, %v41_v7  ;;  %v445_v48 = vld [vmem:[%s705_s8] ss:$0 sm:$0xff] }
   0xb   :  { %500 = vmatprep.mubr.msk.bf16.mxu0 %vm537_vm0, %v536_v0  ;;  %493 = vmatpush3.bf16.msra.mxu0 %v528_v10  ;;  %v449_v58 = vld [vmem:[%s706_s10] ss:$0 sm:$0xff] }
   0xc   :  { %485 = vmatpush3.bf16.msra.mxu1 %v526_v8  ;;  %494 = vmatprep.subr.bf16.mxu0 %v536_v0 }
   0xd   :  { %486 = vmatprep.subr.bf16.mxu1 %v536_v0 }
   0xf   :  { %495 = vmatpush3.bf16.msra.mxu0 %v529_v11 }
  0x10   :  { %487 = vmatpush3.bf16.msra.mxu1 %v527_v9  ;;  %496 = vmatprep.subr.bf16.mxu0 %v536_v0 }
  0x11   :  { %504 = vmatprep.subr.bf16.mxu1 %v536_v0 }
  0x13   :  { %497 = vmatpush3.bf16.msra.mxu0 %v530_v22 }
  0x14   :  { %498 = vmatprep.subr.bf16.mxu0 %v536_v0 }
  0x17   :  { %499 = vmatpush3.bf16.msra.mxu0 %v531_v23 }
  0x18   :  { %512 = vmatprep.subr.bf16.mxu0 %v536_v0 }
  0xdd   :  { %v103_v13 = vpop.f32.mrb[0].mxu0 }
  0xde   :  { %v104_v14 = vadd.f32 %v429_v12, %v103_v13  ;;  %v478_v15 = vpop.f32.mrb[1].mxu0 }
  0xdf   :  { %v106_v16 = vpop.f32.mrb[2].mxu0 }
  0xe0   :  { %v107_v17 = vadd.f32 %v429_v12, %v106_v16  ;;  %v479_v18 = vpop.f32.mrb[3].mxu0  ;;  %v110_v19 = vmax.f32 %v104_v14, 0.0 }
  0xe2   :  { %v111_v20 = vmax.f32 %v107_v17, 0.0 }
  0xe4   :  { %v112_v21 = vpack.c.bf16 %v111_v20, %v110_v19 }
  0xe6   :  { %489 = vmatmul.mubr.msk.bf16.vlgmr.msra.gmra.mrb[0].mxu1 %vm152_vm2, %v112_v21 }
  0xe7   :  { %508 = vmatprep.mubr.msk.bf16.mxu1 %vm537_vm0, %v536_v0  ;;  %505 = vmatpush3.bf16.msra.mxu1 %v532_v34 }
  0xe8   :  { %506 = vmatprep.subr.bf16.mxu1 %v536_v0 }
  0xeb   :  { %507 = vmatpush3.bf16.msra.mxu1 %v533_v35 }
 0x1b9   :  { %v190_v25 = vpop.f32.mrb[0].mxu1 }
 0x1ba   :  { %v191_v26 = vadd.f32 %v433_v24, %v190_v25  ;;  %v490_v27 = vpop.f32.mrb[1].mxu1 }
 0x1bb   :  { %v193_v28 = vpop.f32.mrb[2].mxu1 }
 0x1bc   :  { %v194_v29 = vadd.f32 %v433_v24, %v193_v28  ;;  %v491_v30 = vpop.f32.mrb[3].mxu1  ;;  %v197_v31 = vmax.f32 %v191_v26, 0.0 }
 0x1be   :  { %v198_v32 = vmax.f32 %v194_v29, 0.0 }
 0x1c0   :  { %v199_v33 = vpack.c.bf16 %v198_v32, %v197_v31 }
 0x1c2   :  { %501 = vmatmul.mubr.msk.bf16.vlgmr.msra.gmra.mrb[4].mxu0 %vm152_vm2, %v199_v33 }
 0x1c3   :  { %516 = vmatprep.mubr.msk.bf16.mxu0 %vm537_vm0, %v536_v0  ;;  %513 = vmatpush3.bf16.msra.mxu0 %v534_v46 }
 0x1c4   :  { %514 = vmatprep.subr.bf16.mxu0 %v536_v0 }
 0x1c7   :  { %515 = vmatpush3.bf16.msra.mxu0 %v535_v47 }
 0x295   :  { %v276_v37 = vpop.f32.mrb[4].mxu0 }
 0x296   :  { %v277_v38 = vadd.f32 %v439_v36, %v276_v37  ;;  %v502_v39 = vpop.f32.mrb[5].mxu0 }
 0x297   :  { %v279_v40 = vpop.f32.mrb[6].mxu0 }
 0x298   :  { %v280_v41 = vadd.f32 %v439_v36, %v279_v40  ;;  %v503_v42 = vpop.f32.mrb[7].mxu0  ;;  %v283_v43 = vmax.f32 %v277_v38, 0.0 }
 0x29a   :  { %v284_v44 = vmax.f32 %v280_v41, 0.0 }
 0x29c   :  { %v285_v45 = vpack.c.bf16 %v284_v44, %v283_v43 }
 0x29e   :  { %509 = vmatmul.mubr.msk.bf16.vlgmr.msra.gmra.mrb[4].mxu1 %vm65_vm1, %v285_v45 }
 0x371   :  { %v346_v49 = vpop.f32.mrb[4].mxu1 }
 0x372   :  { %v347_v50 = vadd.f32 %v445_v48, %v346_v49  ;;  %v510_v51 = vpop.f32.mrb[5].mxu1 }
 0x373   :  { %v349_v52 = vpop.f32.mrb[6].mxu1 }
 0x374   :  { %v350_v53 = vadd.f32 %v445_v48, %v349_v52  ;;  %v511_v54 = vpop.f32.mrb[7].mxu1  ;;  %v353_v55 = vmax.f32 %v347_v50, 0.0 }
 0x376   :  { %v354_v56 = vmax.f32 %v350_v53, 0.0 }
 0x378   :  { %v355_v57 = vpack.c.bf16 %v354_v56, %v353_v55 }
 0x37a   :  { %517 = vmatmul.mubr.msk.bf16.vlgmr.msra.gmra.mrb[8].mxu0 %vm65_vm1, %v355_v57 }
 0x44d   :  { %v416_v59 = vpop.f32.mrb[8].mxu0 }
 0x44e   :  { %v417_v60 = vadd.f32 %v449_v58, %v416_v59  ;;  %v518_v61 = vpop.f32.mrb[9].mxu0 }
 0x44f   :  { %v419_v62 = vpop.f32.mrb[10].mxu0 }
 0x450   :  { %423 = vst [vmem:[%s707_s11] sm:$0xff] %v417_v60  ;;  %v420_v63 = vadd.f32 %v449_v58, %v419_v62  ;;  %v519_v0 = vpop.f32.mrb[11].mxu0 }
 0x452   :  { %424 = vst [vmem:[%s707_s11 + $0x8] sm:$0xff] %v420_v63 }

</bundles_post_ra>
